<compile_context>
chip_gen: v5e
topology: v5e:2x2
jax: 0.10.0
libtpu: 0.0.40
codegen_flags: <defaults>
</compile_context>

<pallas_src>
import functools

import jax
import jax.numpy as jnp
from jax.experimental import pallas as pl
from jax.experimental.pallas import tpu as pltpu

EPS = 1e-5
_TARGET_TILE_BYTES = 2 * 1024 * 1024      # ~2 MiB x-block for the tiled path
_VMEM_HEADROOM = 16 * 1024 * 1024         # leave room for compiler scratch


def _vmem_budget_bytes():
    """Per-core VMEM budget with headroom (generation-aware)."""
    cap = 64 * 1024 * 1024                # conservative default (v7x-sized)
    try:
        cap = int(pltpu.get_tpu_info().vmem_capacity_bytes)
    except Exception:                      # pragma: no cover - defensive
        pass
    return max(cap - _VMEM_HEADROOM, cap // 2)


# ---------------------------------------------------------------------------
# Kernel 1: fused 1x1-conv MLPs for l_gamma / l_beta / c_gamma.
# Weights are stacked over the 3 branches and pre-transposed in the wrapper,
# so the kernel is plain  x @ W  on the MXU with no relayout.
# ---------------------------------------------------------------------------
def fused_mlp_kernel(light_ref, color_ref, w1t_ref, b1_ref, w2t_ref, b2_ref,
                     o_ref):
    light = light_ref[...]                      # (B, 128)
    color = color_ref[...]                      # (B, 128)
    xs = (light, light, color)                  # lgamma, lbeta, cgamma inputs
    for j in range(3):                          # unrolled at trace time
        h = jnp.dot(xs[j], w1t_ref[j],
                    preferred_element_type=jnp.float32) + b1_ref[j]
        h = jnp.maximum(h, 0.0)                 # ReLU
        o = jnp.dot(h, w2t_ref[j],
                    preferred_element_type=jnp.float32) + b2_ref[j]
        o_ref[j] = o.astype(o_ref.dtype)        # (B, C)


def fused_conv_mlps(light2d, color2d, params):
    """Run all three (conv -> ReLU -> conv) branches in ONE pallas_call.

    Returns gbc of shape (B, C, 3) = stack([l_gamma, l_beta, c_gamma], -1).
    """
    B = light2d.shape[0]
    branches = (params["lgamma"], params["lbeta"], params["cgamma"])
    C = branches[0][0].shape[0]
    # Pre-transpose so the kernel does x @ W with no in-kernel .T.
    w1t = jnp.stack([w1.T for (w1, _, _, _) in branches])             # (3,128,C)
    b1 = jnp.stack([b1.reshape(1, C) for (_, b1, _, _) in branches])  # (3,1,C)
    w2t = jnp.stack([w2.T for (_, _, w2, _) in branches])             # (3,C,C)
    b2 = jnp.stack([b2.reshape(1, C) for (_, _, _, b2) in branches])  # (3,1,C)

    out = pl.pallas_call(
        fused_mlp_kernel,
        out_shape=jax.ShapeDtypeStruct((3, B, C), jnp.float32),
    )(light2d, color2d, w1t, b1, w2t, b2)
    return jnp.moveaxis(out, 0, -1)             # (B, C, 3), tiny XLA transpose


# ---------------------------------------------------------------------------
# Shared statistics -> affine-coefficient math (runs on tiny (C,1) tensors,
# exact divides / sqrt: zero cost off the hot loop).
# Inputs are PIVOT-SHIFTED sums: s_* = sum(x - p), ssq_* = sum((x - p)^2).
#   out = x*(a_b + m*da) + (b_b + m*db)
# reproduces the light-guided normalization of the reference module.
# ---------------------------------------------------------------------------
def _affine_coefs(s_all, ssq_all, s_f, ssq_f, n_f, pivot, hw, lg, lb, cg):
    n_b = hw - n_f                              # (1,1)
    s_b = s_all - s_f                           # (C,1)
    ssq_b = ssq_all - ssq_f                     # (C,1)

    inv_nf = 1.0 / (n_f + EPS)
    inv_nb = 1.0 / (n_b + EPS)
    mean_f = (s_f + pivot * n_f) * inv_nf       # = sum(m*x)/(n_f+eps)
    mean_b = (s_b + pivot * n_b) * inv_nb
    d_f = mean_f - pivot
    d_b = mean_b - pivot

    var_f = jnp.maximum(
        ssq_f - 2.0 * d_f * s_f + d_f * d_f * n_f, 0.0) * inv_nf
    var_b = jnp.maximum(
        ssq_b - 2.0 * d_b * s_b + d_b * d_b * n_b, 0.0) * inv_nb
    inv_std_f = 1.0 / jnp.sqrt(var_f + EPS)
    inv_std_b = 1.0 / jnp.sqrt(var_b + EPS)

    a_f = inv_std_f * lg * cg
    b_f = (lb - mean_f * inv_std_f * lg) * cg
    a_b = inv_std_b
    b_b = -mean_b * inv_std_b
    return a_b, b_b, a_f - a_b, b_f - b_b       # (a_b, b_b, da, db)


# ---------------------------------------------------------------------------
# In-kernel helpers: chunked stats accumulation and chunked affine apply.
# Chunks are 128/256/512 lanes so partial sums stay vreg-resident (pure VALU
# adds; no slab-sized temporaries, no per-chunk XLU reduces).
# ---------------------------------------------------------------------------
def _accumulate_stats(x_ref, m_ref, pivot_b, chunk, nchunks, init, unroll):
    C = x_ref.shape[1]

    def body(j, carry):
        s, ssq, sf, ssqf, nf = carry
        off = pl.multiple_of(j * chunk, chunk)
        xc = x_ref[0, :, pl.ds(off, chunk)] - pivot_b          # (C, chunk)
        mc = m_ref[0, :, pl.ds(off, chunk)].astype(jnp.float32)  # (1, chunk)
        mcb = jnp.broadcast_to(mc, (C, chunk))
        xsq = xc * xc
        return (s + xc, ssq + xsq, sf + xc * mcb, ssqf + xsq * mcb, nf + mc)

    return jax.lax.fori_loop(0, nchunks, body, init, unroll=unroll)


def _apply_affine(x_ref, m_ref, o_ref, a_b, b_b, da, db, chunk, nchunks):
    C = x_ref.shape[1]
    # Hoist the lane broadcasts out of the loop (no CSE for broadcast_in_dim).
    a_bb = jnp.broadcast_to(a_b, (C, chunk))
    b_bb = jnp.broadcast_to(b_b, (C, chunk))
    da_b = jnp.broadcast_to(da, (C, chunk))
    db_b = jnp.broadcast_to(db, (C, chunk))

    @pl.loop(0, nchunks)
    def _(j):
        off = pl.multiple_of(j * chunk, chunk)
        xc = x_ref[0, :, pl.ds(off, chunk)]
        mc = jnp.broadcast_to(
            m_ref[0, :, pl.ds(off, chunk)].astype(jnp.float32), (C, chunk))
        a = a_bb + mc * da_b
        b = b_bb + mc * db_b
        o_ref[0, :, pl.ds(off, chunk)] = (xc * a + b).astype(o_ref.dtype)


# ---------------------------------------------------------------------------
# Kernel 2a (fused path): whole (C, HW_pad) slab per batch; 1 read + 1 write
# of x through HBM, stats + apply done with chunked in-kernel loops.
# ---------------------------------------------------------------------------
def lg_norm_fused_kernel(x_ref, m_ref, gbc_ref, o_ref, *, hw, n_pad, chunk,
                         unroll):
    C = x_ref.shape[1]
    T = x_ref.shape[2]
    nchunks = T // chunk

    gbc = gbc_ref[0]                            # (C, 3): [lgamma, lbeta, cgamma]
    lg, lb, cg = gbc[:, 0:1], gbc[:, 1:2], gbc[:, 2:3]

    # Per-channel pivot (first-chunk mean) -> cancellation-safe single pass.
    pivot = jnp.sum(x_ref[0, :, 0:chunk], axis=-1, keepdims=True) * (1.0 / chunk)
    pivot_b = jnp.broadcast_to(pivot, (C, chunk))

    zc = jnp.zeros((C, chunk), jnp.float32)
    z1 = jnp.zeros((1, chunk), jnp.float32)
    s, ssq, sf, ssqf, nf = _accumulate_stats(
        x_ref, m_ref, pivot_b, chunk, nchunks, (zc, zc, zc, zc, z1), unroll)

    # Cross-lane (XLU) reduce once; correct for zero-padded pixels (x=0,m=0).
    s_all = jnp.sum(s, axis=-1, keepdims=True) + n_pad * pivot
    ssq_all = jnp.sum(ssq, axis=-1, keepdims=True) - n_pad * pivot * pivot
    s_f = jnp.sum(sf, axis=-1, keepdims=True)
    ssq_f = jnp.sum(ssqf, axis=-1, keepdims=True)
    n_f = jnp.sum(nf, axis=-1, keepdims=True)

    a_b, b_b, da, db = _affine_coefs(
        s_all, ssq_all, s_f, ssq_f, n_f, pivot, hw, lg, lb, cg)
    _apply_affine(x_ref, m_ref, o_ref, a_b, b_b, da, db, chunk, nchunks)


# ---------------------------------------------------------------------------
# Kernel 2b (tiled path, pass 1): accumulate lane-wide shifted partial sums
# into VMEM scratch across spatial tiles; emit per-channel affines on the
# last tile.
# ---------------------------------------------------------------------------
def lg_stats_kernel(x_ref, m_ref, gbc_ref, coef_ref, acc_ref, nacc_ref,
                    piv_ref, *, hw, n_pad, chunk, unroll):
    C = x_ref.shape[1]
    T = x_ref.shape[2]
    nchunks = T // chunk
    t = pl.program_id(1)

    @pl.when(t == 0)
    def _init():
        piv_ref[...] = jnp.sum(
            x_ref[0, :, 0:chunk], axis=-1, keepdims=True) * (1.0 / chunk)
        acc_ref[...] = jnp.zeros_like(acc_ref)
        nacc_ref[...] = jnp.zeros_like(nacc_ref)

    pivot = piv_ref[...]                        # (C, 1)
    pivot_b = jnp.broadcast_to(pivot, (C, chunk))

    init = (acc_ref[:, 0:chunk],
            acc_ref[:, chunk:2 * chunk],
            acc_ref[:, 2 * chunk:3 * chunk],
            acc_ref[:, 3 * chunk:4 * chunk],
            nacc_ref[...])
    s, ssq, sf, ssqf, nf = _accumulate_stats(
        x_ref, m_ref, pivot_b, chunk, nchunks, init, unroll)
    acc_ref[:, 0:chunk] = s
    acc_ref[:, chunk:2 * chunk] = ssq
    acc_ref[:, 2 * chunk:3 * chunk] = sf
    acc_ref[:, 3 * chunk:4 * chunk] = ssqf
    nacc_ref[...] = nf

    @pl.when(t == pl.num_programs(1) - 1)
    def _finalize():
        gbc = gbc_ref[0]                        # (C, 3)
        lg, lb, cg = gbc[:, 0:1], gbc[:, 1:2], gbc[:, 2:3]
        s_all = jnp.sum(s, axis=-1, keepdims=True) + n_pad * pivot
        ssq_all = jnp.sum(ssq, axis=-1, keepdims=True) - n_pad * pivot * pivot
        s_f = jnp.sum(sf, axis=-1, keepdims=True)
        ssq_f = jnp.sum(ssqf, axis=-1, keepdims=True)
        n_f = jnp.sum(nf, axis=-1, keepdims=True)
        a_b, b_b, da, db = _affine_coefs(
            s_all, ssq_all, s_f, ssq_f, n_f, pivot, hw, lg, lb, cg)
        coef_ref[0] = jnp.concatenate([a_b, b_b, da, db], axis=-1)   # (C, 4)


# ---------------------------------------------------------------------------
# Kernel 2c (tiled path, pass 2): apply the per-channel affines per tile.
# ---------------------------------------------------------------------------
def lg_apply_kernel(x_ref, m_ref, coef_ref, o_ref, *, chunk):
    T = x_ref.shape[2]
    nchunks = T // chunk
    coef = coef_ref[0]                          # (C, 4): [a_b, b_b, da, db]
    a_b, b_b = coef[:, 0:1], coef[:, 1:2]
    da, db = coef[:, 2:3], coef[:, 3:4]
    _apply_affine(x_ref, m_ref, o_ref, a_b, b_b, da, db, chunk, nchunks)


# ---------------------------------------------------------------------------
# Host-side planning helpers.
# ---------------------------------------------------------------------------
def _pick_chunk(hw, c):
    """Lane-chunk size; small enough that fori carries stay in vregs."""
    rows = -(-c // 8)
    if rows <= 1:
        cands = (512, 256, 128)
    elif rows <= 2:
        cands = (256, 128)
    else:
        cands = (128,)
    for ch in cands:
        if hw % ch == 0:
            return ch
    return cands[-1]


def _pick_hw_tile(hw_pad, c, chunk):
    """Tile size chosen by BYTES (~2 MiB x-block), multiple of `chunk`."""
    target = max(chunk,
                 min(hw_pad, (_TARGET_TILE_BYTES // (4 * c)) // chunk * chunk))
    t = target
    while t > chunk and hw_pad % t:
        t -= chunk
    if t * 4 < target:
        # No decent divisor: pad up to a multiple of the target tile instead.
        t = target
        hw_pad = -(-hw_pad // t) * t
    return t, hw_pad


# ---------------------------------------------------------------------------
# Wrapper for the normalization kernels.
# ---------------------------------------------------------------------------
def lg_normalize(x_bchw, mask_b1hw, gbc, *, hw_tile=None):
    """x: (B,C,H,W); mask: (B,1,H,W) binary; gbc: (B,C,3)."""
    B, C, H, W = x_bchw.shape
    HW = H * W
    x3 = x_bchw.reshape(B, C, HW).astype(jnp.float32)
    # Binary mask -> exact in bfloat16; halves its HBM read traffic.
    m3 = mask_b1hw.reshape(B, 1, HW).astype(jnp.bfloat16)
    # TODO(synk): for C < 8 the (1, C, T) blocks waste sublanes; row-flattening
    # to (B*C, T) would need a per-row replicated mask (Cx mask traffic), so it
    # is intentionally not done.

    budget = _vmem_budget_bytes()

    if hw_tile is not None:
        assert hw_tile % 128 == 0, "hw_tile must be a multiple of 128"
        chunk = next(ch for ch in (512, 256, 128) if hw_tile % ch == 0)
        hw_pad = -(-HW // hw_tile) * hw_tile
        use_fused = False
    else:
        chunk = _pick_chunk(HW, C)
        hw_pad = -(-HW // chunk) * chunk
        # Fused path while the per-batch slab fits comfortably in VMEM
        # (~14 MiB on 128 MiB parts, ~6 MiB on v7x's 64 MiB).
        use_fused = (C * hw_pad * 4) <= budget // 8
        if not use_fused:
            hw_tile, hw_pad = _pick_hw_tile(hw_pad, C, chunk)

    n_pad = hw_pad - HW
    if n_pad:
        x3 = jnp.pad(x3, ((0, 0), (0, 0), (0, n_pad)))
        m3 = jnp.pad(m3, ((0, 0), (0, 0), (0, n_pad)))

    hw_f = float(HW)

    if use_fused:
        nch = hw_pad // chunk
        out = pl.pallas_call(
            functools.partial(lg_norm_fused_kernel, hw=hw_f, n_pad=n_pad,
                              chunk=chunk, unroll=min(8, nch)),
            out_shape=jax.ShapeDtypeStruct((B, C, hw_pad), jnp.float32),
            grid_spec=pltpu.PrefetchScalarGridSpec(
                num_scalar_prefetch=0,
                grid=(B,),
                in_specs=[
                    pl.BlockSpec((1, C, hw_pad), lambda b: (b, 0, 0)),
                    pl.BlockSpec((1, 1, hw_pad), lambda b: (b, 0, 0)),
                    pl.BlockSpec((1, C, 3), lambda b: (b, 0, 0)),
                ],
                out_specs=pl.BlockSpec((1, C, hw_pad), lambda b: (b, 0, 0)),
            ),
            compiler_params=pltpu.CompilerParams(
                dimension_semantics=("parallel",),
                vmem_limit_bytes=budget),
        )(x3, m3, gbc)
    else:
        # ---- spatially tiled path (large feature maps / v7x VMEM) ---------
        n_t = hw_pad // hw_tile
        nch = hw_tile // chunk

        coefs = pl.pallas_call(
            functools.partial(lg_stats_kernel, hw=hw_f, n_pad=n_pad,
                              chunk=chunk, unroll=min(8, nch)),
            out_shape=jax.ShapeDtypeStruct((B, C, 4), jnp.float32),
            grid_spec=pltpu.PrefetchScalarGridSpec(
                num_scalar_prefetch=0,
                grid=(B, n_t),
                in_specs=[
                    pl.BlockSpec((1, C, hw_tile), lambda b, t: (b, 0, t)),
                    pl.BlockSpec((1, 1, hw_tile), lambda b, t: (b, 0, t)),
                    pl.BlockSpec((1, C, 3), lambda b, t: (b, 0, 0)),
                ],
                out_specs=pl.BlockSpec((1, C, 4), lambda b, t: (b, 0, 0)),
                scratch_shapes=[pltpu.VMEM((C, 4 * chunk), jnp.float32),
                                pltpu.VMEM((1, chunk), jnp.float32),
                                pltpu.VMEM((C, 1), jnp.float32)],
            ),
            compiler_params=pltpu.CompilerParams(
                dimension_semantics=("parallel", "arbitrary"),
                vmem_limit_bytes=budget),
        )(x3, m3, gbc)

        out = pl.pallas_call(
            functools.partial(lg_apply_kernel, chunk=chunk),
            out_shape=jax.ShapeDtypeStruct((B, C, hw_pad), jnp.float32),
            grid_spec=pltpu.PrefetchScalarGridSpec(
                num_scalar_prefetch=0,
                grid=(B, n_t),
                in_specs=[
                    pl.BlockSpec((1, C, hw_tile), lambda b, t: (b, 0, t)),
                    pl.BlockSpec((1, 1, hw_tile), lambda b, t: (b, 0, t)),
                    pl.BlockSpec((1, C, 4), lambda b, t: (b, 0, 0)),
                ],
                out_specs=pl.BlockSpec((1, C, hw_tile), lambda b, t: (b, 0, t)),
            ),
            compiler_params=pltpu.CompilerParams(
                dimension_semantics=("parallel", "parallel"),
                vmem_limit_bytes=budget),
        )(x3, m3, coefs)

    if n_pad:
        out = out[:, :, :HW]
    return out.reshape(B, C, H, W)


# ---------------------------------------------------------------------------
# Glue: PyTorch-style nearest interpolation of the mask (JAX gather, outside
# the kernels).
# ---------------------------------------------------------------------------
def nearest_resize_nchw(m, out_h, out_w):
    B, C, Hi, Wi = m.shape
    ri = (jnp.arange(out_h) * Hi) // out_h
    ci = (jnp.arange(out_w) * Wi) // out_w
    return m[:, :, ri[:, None], ci[None, :]]


# ---------------------------------------------------------------------------
# Full forward
# ---------------------------------------------------------------------------
def du_light_guided_normalization(params, x, mask, light, color, *,
                                  hw_tile=None):
    B, C, H, W = x.shape
    light2d = light.reshape(B, 128)             # Light / color are 1x1 spatial
    color2d = color.reshape(B, 128)
    gbc = fused_conv_mlps(light2d, color2d, params)   # (B, C, 3)
    mask_r = nearest_resize_nchw(mask, H, W)
    return lg_normalize(x, mask_r, gbc, hw_tile=hw_tile)


# ---------------------------------------------------------------------------
# Pure-JAX reference (mirrors the PyTorch code) for verification.
# ---------------------------------------------------------------------------
def _ref_mlp(x2d, w1, b1, w2, b2):
    h = jnp.maximum(x2d @ w1.T + b1, 0.0)
    return h @ w2.T + b2


def _ref_mean_std(region, mask):
    s = jnp.sum(region, axis=(2, 3))
    num = jnp.sum(mask, axis=(2, 3))
    mu = s / (num + EPS)
    mean = mu[:, :, None, None]
    var = jnp.sum((region + (1 - mask) * mean - mean) ** 2,
                  axis=(2, 3)) / (num + EPS)
    var = var[:, :, None, None]
    return mean, jnp.sqrt(var + EPS)


def reference_forward(params, x, mask, light, color):
    B, C, H, W = x.shape
    lg = _ref_mlp(light.reshape(B, 128), *params["lgamma"])[:, :, None, None]
    lb = _ref_mlp(light.reshape(B, 128), *params["lbeta"])[:, :, None, None]
    cg = _ref_mlp(color.reshape(B, 128), *params["cgamma"])[:, :, None, None]
    m = nearest_resize_nchw(mask, H, W)
    mean_b, std_b = _ref_mean_std(x * (1 - m), 1 - m)
    norm_back = ((x - mean_b) / std_b) * (1 - m)
    mean_f, std_f = _ref_mean_std(x * m, m)
    norm_fore = (((x - mean_f) / std_f) * lg + lb) * cg * m
    return norm_fore + norm_back


# ---------------------------------------------------------------------------
# Deterministic parameter init (shapes match nn.Conv2d(128,C,1) / (C,C,1)).
# ---------------------------------------------------------------------------
def init_params(key, in_feature):
    def branch(k):
        k1, k2, k3, k4 = jax.random.split(k, 4)
        w1 = jax.random.normal(k1, (in_feature, 128), jnp.float32) * 0.05
        b1 = jax.random.normal(k2, (in_feature,), jnp.float32) * 0.05
        w2 = jax.random.normal(k3, (in_feature, in_feature), jnp.float32) * 0.05
        b2 = jax.random.normal(k4, (in_feature,), jnp.float32) * 0.05
        return (w1, b1, w2, b2)

    ka, kb, kc = jax.random.split(key, 3)
    return {"lgamma": branch(ka), "lbeta": branch(kb), "cgamma": branch(kc)}


if __name__ == "__main__":
    key = jax.random.PRNGKey(0)
    kx, km, kl, kc, kp = jax.random.split(key, 5)

    def run_case(B, C, H, W, hw_tile=None):
        # Non-zero mean exercises the pivot-shifted (cancellation-safe) stats.
        x = jax.random.normal(kx, (B, C, H, W), jnp.float32) * 2.0 + 3.0
        mask = (jax.random.uniform(
            km, (B, 1, max(H // 2, 1), max(W // 2, 1))) > 0.5).astype(
                jnp.float32)
        light = jax.random.normal(kl, (B, 128, 1, 1), jnp.float32)
        color = jax.random.normal(kc, (B, 128, 1, 1), jnp.float32)
        params = init_params(kp, C)

        ref = reference_forward(params, x, mask, light, color)
        out = du_light_guided_normalization(params, x, mask, light, color,
                                            hw_tile=hw_tile)
        out = jax.block_until_ready(out)
        assert out.shape == (B, C, H, W)
        err = float(jnp.max(jnp.abs(out - ref)))
        assert jnp.allclose(out, ref, atol=1e-4, rtol=1e-4), (
            f"case B={B} C={C} H={H} W={W} hw_tile={hw_tile}: "
            f"max abs err {err}")

    run_case(2, 4, 16, 16)                 # fused (single-slab) path
    run_case(2, 4, 16, 16, hw_tile=128)    # forced tiled path (2 tiles/batch)
    run_case(2, 4, 12, 12)                 # HW not 128-divisible -> padded

    print("KERNEL_OK")
</pallas_src>

<mosaic_0001>
module attributes {stable_mosaic.version = 11 : i64} {
  func.func @fused_mlp_kernel(%arg0: memref<2x128xf32, #tpu.memory_space<vmem>>, %arg1: memref<2x128xf32, #tpu.memory_space<vmem>>, %arg2: memref<3x128x4xf32, #tpu.memory_space<vmem>>, %arg3: memref<3x1x4xf32, #tpu.memory_space<vmem>>, %arg4: memref<3x4x4xf32, #tpu.memory_space<vmem>>, %arg5: memref<3x1x4xf32, #tpu.memory_space<vmem>>, %arg6: memref<3x2x4xf32, #tpu.memory_space<vmem>>) attributes {dimension_semantics = [], scalar_prefetch = 0 : i64, scratch_operands = 0 : i64, tpu.core_type = #tpu.core_type<tc>} {
    %c0 = arith.constant 0 : index
    %c0_0 = arith.constant 0 : index
    %0 = vector.load %arg0[%c0, %c0_0] : memref<2x128xf32, #tpu.memory_space<vmem>>, vector<2x128xf32>
    %c0_1 = arith.constant 0 : index
    %c0_2 = arith.constant 0 : index
    %1 = vector.load %arg1[%c0_1, %c0_2] : memref<2x128xf32, #tpu.memory_space<vmem>>, vector<2x128xf32>
    %c0_3 = arith.constant 0 : index
    %c0_4 = arith.constant 0 : index
    %c0_5 = arith.constant 0 : index
    %2 = vector.load %arg2[%c0_3, %c0_4, %c0_5] : memref<3x128x4xf32, #tpu.memory_space<vmem>>, vector<1x128x4xf32>
    %3 = vector.shape_cast %2 : vector<1x128x4xf32> to vector<128x4xf32>
    %cst = arith.constant dense<0.000000e+00> : vector<2x4xf32>
    %4 = tpu.matmul %0, %3, %cst {dimension_numbers = #tpu.dot_dimension_numbers<[1], [0], [0], [1], [0, 0, 1, 1], [], []>} : vector<2x128xf32>, vector<128x4xf32>, vector<2x4xf32> -> vector<2x4xf32>
    %c0_6 = arith.constant 0 : index
    %c0_7 = arith.constant 0 : index
    %c0_8 = arith.constant 0 : index
    %5 = vector.load %arg3[%c0_6, %c0_7, %c0_8] : memref<3x1x4xf32, #tpu.memory_space<vmem>>, vector<1x1x4xf32>
    %6 = vector.shape_cast %5 : vector<1x1x4xf32> to vector<1x4xf32>
    %7 = vector.broadcast %6 : vector<1x4xf32> to vector<2x4xf32>
    %8 = arith.addf %4, %7 : vector<2x4xf32>
    %cst_9 = arith.constant 0.000000e+00 : f32
    %9 = vector.broadcast %cst_9 : f32 to vector<2x4xf32>
    %10 = arith.maximumf %8, %9 : vector<2x4xf32>
    %c0_10 = arith.constant 0 : index
    %c0_11 = arith.constant 0 : index
    %c0_12 = arith.constant 0 : index
    %11 = vector.load %arg4[%c0_10, %c0_11, %c0_12] : memref<3x4x4xf32, #tpu.memory_space<vmem>>, vector<1x4x4xf32>
    %12 = vector.shape_cast %11 : vector<1x4x4xf32> to vector<4x4xf32>
    %cst_13 = arith.constant dense<0.000000e+00> : vector<2x4xf32>
    %13 = tpu.matmul %10, %12, %cst_13 {dimension_numbers = #tpu.dot_dimension_numbers<[1], [0], [0], [1], [0, 0, 1, 1], [], []>} : vector<2x4xf32>, vector<4x4xf32>, vector<2x4xf32> -> vector<2x4xf32>
    %c0_14 = arith.constant 0 : index
    %c0_15 = arith.constant 0 : index
    %c0_16 = arith.constant 0 : index
    %14 = vector.load %arg5[%c0_14, %c0_15, %c0_16] : memref<3x1x4xf32, #tpu.memory_space<vmem>>, vector<1x1x4xf32>
    %15 = vector.shape_cast %14 : vector<1x1x4xf32> to vector<1x4xf32>
    %16 = vector.broadcast %15 : vector<1x4xf32> to vector<2x4xf32>
    %17 = arith.addf %13, %16 : vector<2x4xf32>
    %c0_17 = arith.constant 0 : index
    %c0_18 = arith.constant 0 : index
    %c0_19 = arith.constant 0 : index
    %18 = vector.load %arg6[%c0_17, %c0_18, %c0_19] : memref<3x2x4xf32, #tpu.memory_space<vmem>>, vector<1x2x4xf32>
    %19 = vector.shape_cast %18 : vector<1x2x4xf32> to vector<2x4xf32>
    %20 = vector.shape_cast %17 : vector<2x4xf32> to vector<1x2x4xf32>
    tpu.vector_store %arg6[%c0_17, %c0_18, %c0_19], %20 {strides = array<i32>} : memref<3x2x4xf32, #tpu.memory_space<vmem>>, vector<1x2x4xf32>,
    %c1 = arith.constant 1 : index
    %c0_20 = arith.constant 0 : index
    %c0_21 = arith.constant 0 : index
    %21 = vector.load %arg2[%c1, %c0_20, %c0_21] : memref<3x128x4xf32, #tpu.memory_space<vmem>>, vector<1x128x4xf32>
    %22 = vector.shape_cast %21 : vector<1x128x4xf32> to vector<128x4xf32>
    %cst_22 = arith.constant dense<0.000000e+00> : vector<2x4xf32>
    %23 = tpu.matmul %0, %22, %cst_22 {dimension_numbers = #tpu.dot_dimension_numbers<[1], [0], [0], [1], [0, 0, 1, 1], [], []>} : vector<2x128xf32>, vector<128x4xf32>, vector<2x4xf32> -> vector<2x4xf32>
    %c1_23 = arith.constant 1 : index
    %c0_24 = arith.constant 0 : index
    %c0_25 = arith.constant 0 : index
    %24 = vector.load %arg3[%c1_23, %c0_24, %c0_25] : memref<3x1x4xf32, #tpu.memory_space<vmem>>, vector<1x1x4xf32>
    %25 = vector.shape_cast %24 : vector<1x1x4xf32> to vector<1x4xf32>
    %26 = vector.broadcast %25 : vector<1x4xf32> to vector<2x4xf32>
    %27 = arith.addf %23, %26 : vector<2x4xf32>
    %cst_26 = arith.constant 0.000000e+00 : f32
    %28 = vector.broadcast %cst_26 : f32 to vector<2x4xf32>
    %29 = arith.maximumf %27, %28 : vector<2x4xf32>
    %c1_27 = arith.constant 1 : index
    %c0_28 = arith.constant 0 : index
    %c0_29 = arith.constant 0 : index
    %30 = vector.load %arg4[%c1_27, %c0_28, %c0_29] : memref<3x4x4xf32, #tpu.memory_space<vmem>>, vector<1x4x4xf32>
    %31 = vector.shape_cast %30 : vector<1x4x4xf32> to vector<4x4xf32>
    %cst_30 = arith.constant dense<0.000000e+00> : vector<2x4xf32>
    %32 = tpu.matmul %29, %31, %cst_30 {dimension_numbers = #tpu.dot_dimension_numbers<[1], [0], [0], [1], [0, 0, 1, 1], [], []>} : vector<2x4xf32>, vector<4x4xf32>, vector<2x4xf32> -> vector<2x4xf32>
    %c1_31 = arith.constant 1 : index
    %c0_32 = arith.constant 0 : index
    %c0_33 = arith.constant 0 : index
    %33 = vector.load %arg5[%c1_31, %c0_32, %c0_33] : memref<3x1x4xf32, #tpu.memory_space<vmem>>, vector<1x1x4xf32>
    %34 = vector.shape_cast %33 : vector<1x1x4xf32> to vector<1x4xf32>
    %35 = vector.broadcast %34 : vector<1x4xf32> to vector<2x4xf32>
    %36 = arith.addf %32, %35 : vector<2x4xf32>
    %c1_34 = arith.constant 1 : index
    %c0_35 = arith.constant 0 : index
    %c0_36 = arith.constant 0 : index
    %37 = vector.load %arg6[%c1_34, %c0_35, %c0_36] : memref<3x2x4xf32, #tpu.memory_space<vmem>>, vector<1x2x4xf32>
    %38 = vector.shape_cast %37 : vector<1x2x4xf32> to vector<2x4xf32>
    %39 = vector.shape_cast %36 : vector<2x4xf32> to vector<1x2x4xf32>
    tpu.vector_store %arg6[%c1_34, %c0_35, %c0_36], %39 {strides = array<i32>} : memref<3x2x4xf32, #tpu.memory_space<vmem>>, vector<1x2x4xf32>,
    %c2 = arith.constant 2 : index
    %c0_37 = arith.constant 0 : index
    %c0_38 = arith.constant 0 : index
    %40 = vector.load %arg2[%c2, %c0_37, %c0_38] : memref<3x128x4xf32, #tpu.memory_space<vmem>>, vector<1x128x4xf32>
    %41 = vector.shape_cast %40 : vector<1x128x4xf32> to vector<128x4xf32>
    %cst_39 = arith.constant dense<0.000000e+00> : vector<2x4xf32>
    %42 = tpu.matmul %1, %41, %cst_39 {dimension_numbers = #tpu.dot_dimension_numbers<[1], [0], [0], [1], [0, 0, 1, 1], [], []>} : vector<2x128xf32>, vector<128x4xf32>, vector<2x4xf32> -> vector<2x4xf32>
    %c2_40 = arith.constant 2 : index
    %c0_41 = arith.constant 0 : index
    %c0_42 = arith.constant 0 : index
    %43 = vector.load %arg3[%c2_40, %c0_41, %c0_42] : memref<3x1x4xf32, #tpu.memory_space<vmem>>, vector<1x1x4xf32>
    %44 = vector.shape_cast %43 : vector<1x1x4xf32> to vector<1x4xf32>
    %45 = vector.broadcast %44 : vector<1x4xf32> to vector<2x4xf32>
    %46 = arith.addf %42, %45 : vector<2x4xf32>
    %cst_43 = arith.constant 0.000000e+00 : f32
    %47 = vector.broadcast %cst_43 : f32 to vector<2x4xf32>
    %48 = arith.maximumf %46, %47 : vector<2x4xf32>
    %c2_44 = arith.constant 2 : index
    %c0_45 = arith.constant 0 : index
    %c0_46 = arith.constant 0 : index
    %49 = vector.load %arg4[%c2_44, %c0_45, %c0_46] : memref<3x4x4xf32, #tpu.memory_space<vmem>>, vector<1x4x4xf32>
    %50 = vector.shape_cast %49 : vector<1x4x4xf32> to vector<4x4xf32>
    %cst_47 = arith.constant dense<0.000000e+00> : vector<2x4xf32>
    %51 = tpu.matmul %48, %50, %cst_47 {dimension_numbers = #tpu.dot_dimension_numbers<[1], [0], [0], [1], [0, 0, 1, 1], [], []>} : vector<2x4xf32>, vector<4x4xf32>, vector<2x4xf32> -> vector<2x4xf32>
    %c2_48 = arith.constant 2 : index
    %c0_49 = arith.constant 0 : index
    %c0_50 = arith.constant 0 : index
    %52 = vector.load %arg5[%c2_48, %c0_49, %c0_50] : memref<3x1x4xf32, #tpu.memory_space<vmem>>, vector<1x1x4xf32>
    %53 = vector.shape_cast %52 : vector<1x1x4xf32> to vector<1x4xf32>
    %54 = vector.broadcast %53 : vector<1x4xf32> to vector<2x4xf32>
    %55 = arith.addf %51, %54 : vector<2x4xf32>
    %c2_51 = arith.constant 2 : index
    %c0_52 = arith.constant 0 : index
    %c0_53 = arith.constant 0 : index
    %56 = vector.load %arg6[%c2_51, %c0_52, %c0_53] : memref<3x2x4xf32, #tpu.memory_space<vmem>>, vector<1x2x4xf32>
    %57 = vector.shape_cast %56 : vector<1x2x4xf32> to vector<2x4xf32>
    %58 = vector.shape_cast %55 : vector<2x4xf32> to vector<1x2x4xf32>
    tpu.vector_store %arg6[%c2_51, %c0_52, %c0_53], %58 {strides = array<i32>} : memref<3x2x4xf32, #tpu.memory_space<vmem>>, vector<1x2x4xf32>,
    return
  }
}

</mosaic_0001>

<bundles_post_ra>
// kernel: tpu_custom_call.1
= control target key start
LH: loop header
LB: loop body
LE: loop exit
PB: predicated region body
PF: predicated region fallthrough
CT: control target
= control target key end

     0   :  { %s573_s0 = inlined_call_operand.vmem [shape: f32[2,128], index: 0, kind: input, shape index: {}]   ;;  %s574_s1 = inlined_call_operand.vmem [shape: f32[2,128], index: 1, kind: input, shape index: {}]   ;;  %s575_s2 = inlined_call_operand.vmem [shape: f32[3,128,4], index: 2, kind: input, shape index: {}]   ;;  %s576_s3 = inlined_call_operand.vmem [shape: f32[3,1,4], index: 3, kind: input, shape index: {}]   ;;  %s577_s4 = inlined_call_operand.vmem [shape: f32[3,4,4], index: 4, kind: input, shape index: {}]   ;;  %s578_s5 = inlined_call_operand.vmem [shape: f32[3,1,4], index: 5, kind: input, shape index: {}]   ;;  %s579_s6 = inlined_call_operand.hbm [shape: f32[3,2,4], index: 6, kind: output, shape index: {}]  }
   0x1   :  { %v41_v0 = vld [vmem:[%s575_s2 + $0x78] sm:$0xff]  ;;  %v40_v1 = vld [vmem:[%s575_s2 + $0x70] sm:$0xff]  ;;  %v39_v4 = vld [vmem:[%s575_s2 + $0x68] sm:$0xff] }
   0x2   :  { %v293_v2 = vld [vmem:[%s575_s2 + $0xf8] sm:$0xff]  ;;  %46 = vmatpush.msra.mxu0 %v41_v0  ;;  %v292_v3 = vld [vmem:[%s575_s2 + $0xf0] sm:$0xff]  ;;  %v291_v5 = vld [vmem:[%s575_s2 + $0xe8] sm:$0xff] }
   0x3   :  { %124 = vmatpush.msra.mxu2 %v293_v2  ;;  %v38_v6 = vld [vmem:[%s575_s2 + $0x60] sm:$0xff]  ;;  %v314_v8 = vld [vmem:[%s575_s2 + $0x178] sm:$0xff]  ;;  %v313_v11 = vld [vmem:[%s575_s2 + $0x170] sm:$0xff] }
   0x4   :  { %47 = vmatpush.msra.mxu0 %v40_v1  ;;  %v290_v7 = vld [vmem:[%s575_s2 + $0xe0] sm:$0xff]  ;;  %v37_v9 = vld [vmem:[%s575_s2 + $0x58] sm:$0xff]  ;;  %202 = vmatpush.msra.mxu1 %v314_v8  ;;  %v312_v12 = vld [vmem:[%s575_s2 + $0x168] sm:$0xff] }
   0x5   :  { %125 = vmatpush.msra.mxu2 %v292_v3  ;;  %v289_v10 = vld [vmem:[%s575_s2 + $0xd8] sm:$0xff]  ;;  %v36_v13 = vld [vmem:[%s575_s2 + $0x50] sm:$0xff]  ;;  %v311_v15 = vld [vmem:[%s575_s2 + $0x160] sm:$0xff] }
   0x6   :  { %48 = vmatpush.msra.mxu0 %v39_v4  ;;  %v288_v14 = vld [vmem:[%s575_s2 + $0xd0] sm:$0xff]  ;;  %203 = vmatpush.msra.mxu1 %v313_v11  ;;  %v35_v16 = vld [vmem:[%s575_s2 + $0x48] sm:$0xff]  ;;  %v310_v18 = vld [vmem:[%s575_s2 + $0x158] sm:$0xff] }
   0x7   :  { %126 = vmatpush.msra.mxu2 %v291_v5  ;;  %v287_v17 = vld [vmem:[%s575_s2 + $0xc8] sm:$0xff]  ;;  %v34_v19 = vld [vmem:[%s575_s2 + $0x40] sm:$0xff]  ;;  %v309_v21 = vld [vmem:[%s575_s2 + $0x150] sm:$0xff] }
   0x8   :  { %49 = vmatpush.msra.mxu0 %v38_v6  ;;  %204 = vmatpush.msra.mxu1 %v312_v12  ;;  %v286_v20 = vld [vmem:[%s575_s2 + $0xc0] sm:$0xff]  ;;  %v33_v22 = vld [vmem:[%s575_s2 + $0x38] sm:$0xff]  ;;  %v32_v24 = vld [vmem:[%s575_s2 + $0x30] sm:$0xff] }
   0x9   :  { %127 = vmatpush.msra.mxu2 %v290_v7  ;;  %v285_v23 = vld [vmem:[%s575_s2 + $0xb8] sm:$0xff]  ;;  %v308_v25 = vld [vmem:[%s575_s2 + $0x148] sm:$0xff]  ;;  %v284_v27 = vld [vmem:[%s575_s2 + $0xb0] sm:$0xff] }
   0xa   :  { %50 = vmatpush.msra.mxu0 %v37_v9  ;;  %205 = vmatpush.msra.mxu1 %v311_v15  ;;  %v31_v26 = vld [vmem:[%s575_s2 + $0x28] sm:$0xff]  ;;  %v307_v29 = vld [vmem:[%s575_s2 + $0x140] sm:$0xff]  ;;  %v306_v30 = vld [vmem:[%s575_s2 + $0x138] sm:$0xff] }
   0xb   :  { %128 = vmatpush.msra.mxu2 %v289_v10  ;;  %v283_v28 = vld [vmem:[%s575_s2 + $0xa8] sm:$0xff] }
   0xc   :  { %51 = vmatpush.msra.mxu0 %v36_v13  ;;  %206 = vmatpush.msra.mxu1 %v310_v18 }
   0xd   :  { %129 = vmatpush.msra.mxu2 %v288_v14 }
   0xe   :  { %52 = vmatpush.msra.mxu0 %v35_v16  ;;  %207 = vmatpush.msra.mxu1 %v309_v21 }
   0xf   :  { %130 = vmatpush.msra.mxu2 %v287_v17 }
  0x10   :  { %53 = vmatpush.msra.mxu0 %v34_v19  ;;  %208 = vmatpush.msra.mxu1 %v308_v25 }
  0x11   :  { %131 = vmatpush.msra.mxu2 %v286_v20 }
  0x12   :  { %54 = vmatpush.msra.mxu0 %v33_v22 }
  0x13   :  { %132 = vmatpush.msra.mxu2 %v285_v23 }
  0x14   :  { %55 = vmatpush.msra.mxu0 %v32_v24 }
  0x15   :  { %133 = vmatpush.msra.mxu2 %v284_v27 }
  0x16   :  { %11 = vsyncpa [#allocation3], 0  ;;  %v30_v31 = vld [vmem:[%s575_s2 + $0x20] sm:$0xff]  ;;  %209 = vmatpush.msra.mxu1 %v307_v29  ;;  %56 = vmatpush.msra.mxu0 %v31_v26  ;;  %v305_v33 = vld [vmem:[%s575_s2 + $0x130] sm:$0xff]  ;;  %vm76_vm0 = vcmask 1043456   ;;  %vm72_vm1 = vcmask 31744  }
  0x17   :  { %v282_v32 = vld [vmem:[%s575_s2 + $0xa0] sm:$0xff]  ;;  %134 = vmatpush.msra.mxu2 %v283_v28  ;;  %v29_v34 = vld [vmem:[%s575_s2 + $0x18] sm:$0xff]  ;;  %v304_v36 = vld [vmem:[%s575_s2 + $0x128] sm:$0xff]  ;;  %vm100_vm2 = vcmask 25600   ;;  %s355_s14 = smov [#allocation2]   ;;  %s264_s18 = sshll.u32 %s579_s6, 4  ;;  %s265_s18 = int_to_ptr.hbm [resolvable:$true] %s264_s18 }
  0x18   :  { %v281_v35 = vld [vmem:[%s575_s2 + $0x98] sm:$0xff]  ;;  %210 = vmatpush.msra.mxu1 %v306_v30  ;;  %57 = vmatpush.msra.mxu0 %v30_v31  ;;  %v28_v37 = vld [vmem:[%s575_s2 + $0x10] sm:$0xff]  ;;  %v303_v39 = vld [vmem:[%s575_s2 + $0x120] sm:$0xff]  ;;  %s262_s15 = sshll.u32 %s355_s14, 4  ;;  %s356_s19 = smov 32   ;;  %s263_s15 = int_to_ptr.vmem [resolvable:$true] %s262_s15 }
  0x19   :  { %135 = vmatpush.msra.mxu2 %v282_v32  ;;  %v280_v38 = vld [vmem:[%s575_s2 + $0x90] sm:$0xff]  ;;  %v27_v40 = vld [vmem:[%s575_s2 + $0x8] sm:$0xff]  ;;  %v302_v42 = vld [vmem:[%s575_s2 + $0x118] sm:$0xff]  ;;  %s357_s20 = smov 2  }
  0x1a   :  { %211 = vmatpush.msra.mxu1 %v305_v33  ;;  %58 = vmatpush.msra.mxu0 %v29_v34  ;;  %v279_v41 = vld [vmem:[%s575_s2 + $0x88] sm:$0xff]  ;;  %v26_v43 = vld [vmem:[%s575_s2] sm:$0xff]  ;;  %v301_v46 = vld [vmem:[%s575_s2 + $0x110] sm:$0xff] }
  0x1b   :  { %136 = vmatpush.msra.mxu2 %v281_v35  ;;  %v278_v44 = vld [vmem:[%s575_s2 + $0x80] sm:$0xff]  ;;  %v300_v47 = vld [vmem:[%s575_s2 + $0x108] sm:$0xff] }
  0x1c   :  { %212 = vmatpush.msra.mxu1 %v304_v36  ;;  %59 = vmatpush.msra.mxu0 %v28_v37  ;;  %v24_v45 = vld [vmem:[%s573_s0] sm:$0x3]  ;;  %v295_v51 = vld [vmem:[%s577_s4 + $0x4] sm:$0xf]  ;;  %v316_v57 = vld [vmem:[%s577_s4 + $0x8] sm:$0xf] }
  0x1d   :  { %137 = vmatpush.msra.mxu2 %v280_v38  ;;  %v299_v48 = vld [vmem:[%s575_s2 + $0x100] sm:$0xff] }
  0x1e   :  { %213 = vmatpush.msra.mxu1 %v303_v39  ;;  %60 = vmatpush.msra.mxu0 %v27_v40  ;;  %v25_v49 = vld [vmem:[%s574_s1] sm:$0x3]  ;;  %v325_v61 = vld [vmem:[%s576_s3 + $0x2] ss:$0 sm:$0xff] }
  0x1f   :  { %138 = vmatpush.msra.mxu2 %v279_v41  ;;  %v67_v50 = vld [vmem:[%s577_s4] sm:$0xf] }
  0x20   :  { %214 = vmatpush.msra.mxu1 %v302_v42  ;;  %61 = vmatpush.msra.mxu0 %v26_v43  ;;  %v323_v52 = vld [vmem:[%s576_s3] ss:$0 sm:$0xff]  ;;  %v324_v56 = vld [vmem:[%s576_s3 + $0x1] ss:$0 sm:$0xff]  ;;  %v328_v7 = vld [vmem:[%s578_s5 + $0x2] ss:$0 sm:$0xff] }
  0x21   :  { %139 = vmatpush.msra.mxu2 %v278_v44  ;;  %62 = vmatmul.f32.vlgmr.msra.gmra.mxu0 %v24_v45  ;;  %v326_v1 = vld [vmem:[%s578_s5] ss:$0 sm:$0xff]  ;;  %v327_v4 = vld [vmem:[%s578_s5 + $0x1] ss:$0 sm:$0xff] }
  0x22   :  { %140 = vmatmul.f32.vlgmr.msra.gmra.mxu2 %v24_v45  ;;  %215 = vmatpush.msra.mxu1 %v301_v46 }
  0x23   :  { %276 = vmatpush.msk.msra.mxu3 %vm76_vm0, %v67_v50 }
  0x24   :  { %216 = vmatpush.msra.mxu1 %v300_v47 }
  0x25   :  { %297 = vmatpush.msk.msrb.mxu3 %vm76_vm0, %v295_v51 }
  0x26   :  { %217 = vmatpush.msra.mxu1 %v299_v48 }
  0x27   :  { %218 = vmatmul.f32.vlgmr.msra.gmra.mxu1 %v25_v49 }
  0x9e   :  { %v63_v53 = vpop.f32.mrf.mxu0 }
  0x9f   :  { %v64_v54 = vadd.f32 %v323_v52, %v63_v53 }
  0xa1   :  { %v66_v55 = vmax.f32 %v64_v54, 0.0 }
  0xa3   :  { %277 = vmatmul.msk.f32.vlgmr.msra.gmra.mxu3 %vm72_vm1, %v66_v55 }
  0xa4   :  { %318 = vmatpush.msk.msra.mxu3 %vm76_vm0, %v316_v57  ;;  %v219_v62 = vpop.f32.mrf.mxu1 }
  0xa5   :  { %v141_v58 = vpop.f32.mrf.mxu2  ;;  %v220_v63 = vadd.f32 %v325_v61, %v219_v62 }
  0xa6   :  { %v142_v59 = vadd.f32 %v324_v56, %v141_v58 }
  0xa7   :  { %v222_v0 = vmax.f32 %v220_v63, 0.0 }
  0xa8   :  { %v144_v60 = vmax.f32 %v142_v59, 0.0 }
  0xab   :  { %298 = vmatmul.msk.f32.vlgmr.msrb.gmra.mxu3 %vm72_vm1, %v144_v60 }
  0xb3   :  { %319 = vmatmul.msk.f32.vlgmr.msra.gmra.mxu3 %vm72_vm1, %v222_v0 }
 0x126   :  { %v97_v2 = vpop.f32.mrf.mxu3 }
 0x127   :  { %v98_v3 = vadd.f32 %v326_v1, %v97_v2 }
 0x129   :  { %101 = vst.msk [vmem:[#allocation2] sm:$0x3] %vm100_vm2, %v98_v3 }
 0x12e   :  { %v175_v5 = vpop.f32.mrf.mxu3 }
 0x12f   :  { %v176_v6 = vadd.f32 %v327_v4, %v175_v5 }
 0x131   :  { %179 = vst.msk [vmem:[#allocation2 + $0x2] sm:$0x3] %vm100_vm2, %v176_v6 }
 0x136   :  { %v253_v8 = vpop.f32.mrf.mxu3 }
 0x137   :  { %v254_v9 = vadd.f32 %v328_v7, %v253_v8 }
 0x139   :  { %257 = vst.msk [vmem:[#allocation2 + $0x4] sm:$0x3] %vm100_vm2, %v254_v9 }
 0x13a   :  { %270 = dma.vmem_to_hbm [thread:$0]  %s263_s15, 96, %s265_s18, [#allocation3], %s356_s19, %s356_s19, %s357_s20  }
 0x13b   :  { %353 = dma.done.wait [#allocation3], 96  }
 0x13c   :  { %354 = vsyncadd [#allocation3], 4294967200 }
 0x13d   :  { %275 = vsyncpa [#allocation3], 1 }

</bundles_post_ra>
